<compile_context>
chip_gen: v7x
topology: tpu7x:2x2x1
jax: 0.10.0
libtpu: 0.0.40
codegen_flags: <defaults>
</compile_context>

<pallas_src>
from typing import NamedTuple

import jax
import jax.numpy as jnp
import numpy as np
from jax.experimental import pallas as pl
from jax.experimental.pallas import tpu as pltpu


def _round_up(x: int, m: int) -> int:
    return ((x + m - 1) // m) * m


def _choose_tile(dim: int, cap: int, align: int):
    """Pick a tile <= cap (multiple of `align`) that evenly divides a minimally
    padded `dim`.  Returns (tile, padded_dim)."""
    dim_al = _round_up(dim, align)
    cap = max(align, (cap // align) * align)
    if dim_al <= cap:
        return dim_al, dim_al
    n_blocks = -(-dim_al // cap)                      # ceil div
    tile = _round_up(-(-dim_al // n_blocks), align)   # <= cap by construction
    return tile, tile * n_blocks


# ----------------------------------------------------------------------------- kernel
def _feature_to_latent_kernel(x_ref, w_ref, b_ref, o_ref, acc_ref):
    k = pl.program_id(2)

    @pl.when(k == 0)
    def _init():
        # Fold the bias into the accumulator init -> epilogue is a pure cast+store.
        acc_ref[...] = jnp.broadcast_to(
            b_ref[...].astype(jnp.float32), acc_ref.shape
        )

    # x tile (tm, tk) in its native dtype; cast to the weight's compute dtype on the
    # VPU (avoids a separate XLA cast pass over x in HBM).  Weight tile is already in
    # the canonical (tk, tn) layout, so this is a plain MXU (tm,tk)x(tk,tn) matmul
    # with f32 accumulation.
    acc_ref[...] += jnp.dot(
        x_ref[...].astype(w_ref.dtype),
        w_ref[...],
        preferred_element_type=jnp.float32,
    )

    @pl.when(k == pl.num_programs(2) - 1)
    def _finalize():
        o_ref[...] = acc_ref[...].astype(o_ref.dtype)


# ------------------------------------------------------------------ one-time parameter prep
class FeatureToLatentParams(NamedTuple):
    w_t: jax.Array        # (F_pad, L_pad), transposed + padded + cast ONCE at load time
    b: jax.Array          # (1, L_pad) float32
    latent_dim: int       # original L
    features: int         # original F = channels * timesteps
    tn: int               # latent tile
    tk: int               # feature (reduction) tile


def prepare_feature_to_latent_params(weight, bias, *, compute_dtype=jnp.bfloat16,
                                     tn_cap: int = 512, tk_cap: int = 2048):
    """One-time prep (do this at model-load time, NOT per forward call).

    weight: (L, F)  PyTorch nn.Linear layout
    bias:   (L,)
    """
    L, F = weight.shape
    tk, F_pad = _choose_tile(F, tk_cap, 128)
    tn, L_pad = _choose_tile(L, tn_cap, 128)

    w_t = weight.T                                    # (F, L): canonical MXU layout
    if (F_pad, L_pad) != (F, L):
        w_t = jnp.pad(w_t, ((0, F_pad - F), (0, L_pad - L)))
    w_t = w_t.astype(compute_dtype)

    b = bias.astype(jnp.float32).reshape(1, L)
    if L_pad != L:
        b = jnp.pad(b, ((0, 0), (0, L_pad - L)))

    return FeatureToLatentParams(w_t, b, L, F, tn, tk)


# ------------------------------------------------------------------------------ forward
def feature_to_latent(x, params: FeatureToLatentParams, *, tm_cap: int = 512,
                      out_dtype=None):
    """Forward of FeatureToLatent: flatten (B, C, T) -> (B, C*T), then Linear.

    x:      (B, C, T)
    params: prepared once via prepare_feature_to_latent_params
    returns (B, latent_dim) in x.dtype (or out_dtype)
    """
    B = x.shape[0]
    F = params.features
    assert int(np.prod(x.shape[1:])) == F, "input feature size mismatch"
    out_dtype = out_dtype or x.dtype

    F_pad, L_pad = params.w_t.shape
    tk, tn = params.tk, params.tn

    # Flatten (free row-major collapse) + pad batch/features to tile multiples.
    x2 = x.reshape(B, F)
    tm, B_pad = _choose_tile(B, tm_cap, 8)            # cover whole batch when possible
    if (B_pad, F_pad) != (B, F):
        x2 = jnp.pad(x2, ((0, B_pad - B), (0, F_pad - F)))

    x_item = x2.dtype.itemsize
    w_item = params.w_t.dtype.itemsize
    out_item = jnp.dtype(out_dtype).itemsize

    grid_i = B_pad // tm
    grid_j = L_pad // tn
    # v7x has 2 TensorCores: make sure the parallel i*j grid has >= 2 iterations when
    # the extra x re-reads this causes stay <= ~25% of the weight stream (so it is
    # cheap insurance on the 1-TC v5e/v6e too).  tn is shrunk to a 128-multiple
    # divisor of L_pad, so the prepared weight padding is unchanged.
    if (grid_i * grid_j == 1 and L_pad >= 256
            and 4 * B_pad * x_item <= L_pad * w_item):
        m = L_pad // 128
        divs = [d for d in range(1, m) if m % d == 0 and 128 * d <= tn]
        if divs:
            tn = 128 * max(divs)
            grid_j = L_pad // tn
    grid_k = F_pad // tk
    grid = (grid_i, grid_j, grid_k)

    # Double-buffered VMEM budget (inputs x2) + resident accumulator; raise the scoped
    # VMEM limit explicitly (v5e default is only 16 MiB), capped well under v7x's
    # 64 MiB physical VMEM.
    vmem_need = (2 * tm * tk * x_item + 2 * tk * tn * w_item + 2 * tn * 4
                 + 2 * tm * tn * out_item + tm * tn * 4)
    vmem_limit = int(min(48 * 2**20, max(32 * 2**20, 2 * vmem_need)))

    cost = pl.CostEstimate(
        flops=2 * B_pad * F_pad * L_pad,
        transcendentals=0,
        bytes_accessed=(grid_j * B_pad * F_pad * x_item      # x re-read per j-block
                        + grid_i * L_pad * F_pad * w_item    # weight re-read per i-block
                        + L_pad * 4                          # bias
                        + B_pad * L_pad * out_item),         # output
    )

    out = pl.pallas_call(
        _feature_to_latent_kernel,
        out_shape=jax.ShapeDtypeStruct((B_pad, L_pad), out_dtype),
        grid_spec=pltpu.PrefetchScalarGridSpec(
            num_scalar_prefetch=0,
            grid=grid,
            in_specs=[
                pl.BlockSpec((tm, tk), lambda i, j, k: (i, k)),   # x      (B_pad, F_pad)
                pl.BlockSpec((tk, tn), lambda i, j, k: (k, j)),   # weight (F_pad, L_pad)
                pl.BlockSpec((1, tn), lambda i, j, k: (0, j)),    # bias   (1, L_pad)
            ],
            out_specs=pl.BlockSpec((tm, tn), lambda i, j, k: (i, j)),
            scratch_shapes=[pltpu.VMEM((tm, tn), jnp.float32)],
        ),
        compiler_params=pltpu.CompilerParams(
            dimension_semantics=("parallel", "parallel", "arbitrary"),
            vmem_limit_bytes=vmem_limit,
        ),
        cost_estimate=cost,
    )(x2, params.w_t, params.b)

    return out[:B, :params.latent_dim]


def feature_to_latent_module(x, weight, bias, *, compute_dtype=jnp.bfloat16):
    """Convenience one-shot wrapper (prepare + apply).  In a real model, call
    prepare_feature_to_latent_params once at load time and reuse the params."""
    params = prepare_feature_to_latent_params(weight, bias, compute_dtype=compute_dtype)
    return feature_to_latent(x, params)


# --------------------------------------------------------------------------------- demo
if __name__ == "__main__":
    key = jax.random.PRNGKey(0)

    # (batch, channels, timesteps, latent_dim)
    cases = [
        (2, 4, 16, 32),     # spec-scale shapes         -> grid (1, 1, 1)
        (8, 8, 64, 256),    # exercises the j-split     -> grid (1, 2, 1)
        (4, 16, 256, 64),   # exercises k accumulation  -> grid (1, 1, 2)
    ]

    for (B, C, T, L) in cases:
        kx, kw, kb, key = jax.random.split(key, 4)
        F = C * T
        # nn.Linear default init: U(-1/sqrt(fan_in), 1/sqrt(fan_in))
        bound = 1.0 / np.sqrt(F)
        weight = jax.random.uniform(kw, (L, F), jnp.float32, -bound, bound)
        bias = jax.random.uniform(kb, (L,), jnp.float32, -bound, bound)
        x = jax.random.normal(kx, (B, C, T), jnp.float32)

        params = prepare_feature_to_latent_params(weight, bias)   # once per model load
        out = jax.block_until_ready(feature_to_latent(x, params))

        # Pure-JAX f32 reference of the forward semantics.  The kernel streams the
        # weight in bf16 (f32 accumulation), so tolerance is bf16-level.
        ref = x.reshape(B, F) @ weight.T + bias
        np.testing.assert_allclose(np.asarray(out), np.asarray(ref),
                                   rtol=2e-2, atol=2e-2)

    print("KERNEL_OK")
</pallas_src>

<mosaic_0001>
module attributes {stable_mosaic.version = 11 : i64} {
  func.func @_feature_to_latent_kernel(%arg0: i32, %arg1: i32, %arg2: i32, %arg3: memref<8x128xf32, #tpu.memory_space<vmem>>, %arg4: memref<128x128xbf16, #tpu.memory_space<vmem>>, %arg5: memref<1x128xf32, #tpu.memory_space<vmem>>, %arg6: memref<8x128xf32, #tpu.memory_space<vmem>>, %arg7: memref<8x128xf32, #tpu.memory_space<vmem>>) attributes {dimension_semantics = [#tpu.dimension_semantics<parallel>, #tpu.dimension_semantics<parallel>, #tpu.dimension_semantics<arbitrary>], iteration_bounds = array<i64: 1, 1, 1>, scalar_prefetch = 0 : i64, scratch_operands = 1 : i64, tpu.core_type = #tpu.core_type<tc>, window_params = [{transform_indices = @transform_0, window_bounds = array<i64: 8, 128>}, {transform_indices = @transform_1, window_bounds = array<i64: 128, 128>}, {transform_indices = @transform_2, window_bounds = array<i64: 1, 128>}, {transform_indices = @transform_3, window_bounds = array<i64: 8, 128>}]} {
    %c0_i32 = arith.constant 0 : i32
    %0 = arith.cmpi eq, %arg2, %c0_i32 : i32
    %1 = arith.extui %0 : i1 to i32
    %c0_i32_0 = arith.constant 0 : i32
    %2 = arith.cmpi ne, %1, %c0_i32_0 : i32
    scf.if %2 {
      %c0_10 = arith.constant 0 : index
      %c0_11 = arith.constant 0 : index
      %13 = vector.load %arg5[%c0_10, %c0_11] : memref<1x128xf32, #tpu.memory_space<vmem>>, vector<1x128xf32>
      %14 = vector.shape_cast %13 : vector<1x128xf32> to vector<1x128xf32>
      %15 = vector.broadcast %14 : vector<1x128xf32> to vector<8x128xf32>
      %c0_12 = arith.constant 0 : index
      %c0_13 = arith.constant 0 : index
      %16 = vector.load %arg7[%c0_12, %c0_13] : memref<8x128xf32, #tpu.memory_space<vmem>>, vector<8x128xf32>
      tpu.vector_store %arg7[%c0_12, %c0_13], %15 {strides = array<i32>} : memref<8x128xf32, #tpu.memory_space<vmem>>, vector<8x128xf32>,
    } else {
    }
    %c0 = arith.constant 0 : index
    %c0_1 = arith.constant 0 : index
    %3 = vector.load %arg7[%c0, %c0_1] : memref<8x128xf32, #tpu.memory_space<vmem>>, vector<8x128xf32>
    %c0_2 = arith.constant 0 : index
    %c0_3 = arith.constant 0 : index
    %4 = vector.load %arg3[%c0_2, %c0_3] : memref<8x128xf32, #tpu.memory_space<vmem>>, vector<8x128xf32>
    %5 = arith.truncf %4 : vector<8x128xf32> to vector<8x128xbf16>
    %c0_4 = arith.constant 0 : index
    %c0_5 = arith.constant 0 : index
    %6 = vector.load %arg4[%c0_4, %c0_5] : memref<128x128xbf16, #tpu.memory_space<vmem>>, vector<128x128xbf16>
    %cst = arith.constant dense<0.000000e+00> : vector<8x128xf32>
    %7 = tpu.matmul %5, %6, %cst {dimension_numbers = #tpu.dot_dimension_numbers<[1], [0], [0], [1], [0, 0, 1, 1], [], []>} : vector<8x128xbf16>, vector<128x128xbf16>, vector<8x128xf32> -> vector<8x128xf32>
    %8 = arith.addf %3, %7 : vector<8x128xf32>
    %c0_6 = arith.constant 0 : index
    %c0_7 = arith.constant 0 : index
    %9 = vector.load %arg7[%c0_6, %c0_7] : memref<8x128xf32, #tpu.memory_space<vmem>>, vector<8x128xf32>
    tpu.vector_store %arg7[%c0_6, %c0_7], %8 {strides = array<i32>} : memref<8x128xf32, #tpu.memory_space<vmem>>, vector<8x128xf32>,
    %c0_i32_8 = arith.constant 0 : i32
    %10 = arith.cmpi eq, %arg2, %c0_i32_8 : i32
    %11 = arith.extui %10 : i1 to i32
    %c0_i32_9 = arith.constant 0 : i32
    %12 = arith.cmpi ne, %11, %c0_i32_9 : i32
    scf.if %12 {
      %c0_10 = arith.constant 0 : index
      %c0_11 = arith.constant 0 : index
      %13 = vector.load %arg7[%c0_10, %c0_11] : memref<8x128xf32, #tpu.memory_space<vmem>>, vector<8x128xf32>
      %c0_12 = arith.constant 0 : index
      %c0_13 = arith.constant 0 : index
      %14 = vector.load %arg6[%c0_12, %c0_13] : memref<8x128xf32, #tpu.memory_space<vmem>>, vector<8x128xf32>
      tpu.vector_store %arg6[%c0_12, %c0_13], %13 {strides = array<i32>} : memref<8x128xf32, #tpu.memory_space<vmem>>, vector<8x128xf32>,
    } else {
    }
    return
  }
  func.func @transform_0(%arg0: i32, %arg1: i32, %arg2: i32) -> (i32, i32) {
    %c0_i32 = arith.constant 0 : i32
    return %arg0, %arg2 : i32, i32
  }
  func.func @transform_1(%arg0: i32, %arg1: i32, %arg2: i32) -> (i32, i32) {
    %c0_i32 = arith.constant 0 : i32
    return %arg2, %arg1 : i32, i32
  }
  func.func @transform_2(%arg0: i32, %arg1: i32, %arg2: i32) -> (i32, i32) {
    %c0_i32 = arith.constant 0 : i32
    %c0_i32_0 = arith.constant 0 : i32
    return %c0_i32, %arg1 : i32, i32
  }
  func.func @transform_3(%arg0: i32, %arg1: i32, %arg2: i32) -> (i32, i32) {
    %c0_i32 = arith.constant 0 : i32
    return %arg0, %arg1 : i32, i32
  }
}

</mosaic_0001>

<bundles_post_ra>
// kernel: tpu_custom_call.1
= control target key start
LH: loop header
LB: loop body
LE: loop exit
PB: predicated region body
PF: predicated region fallthrough
CT: control target
= control target key end

     0   :  { %8 = vsyncpa [#allocation4], 0  ;;  %s382_s0 = inlined_call_operand.hbm [shape: f32[8,128], index: 0, kind: input, shape index: {}]   ;;  %s383_s1 = inlined_call_operand.hbm [shape: bf16[128,128], index: 1, kind: input, shape index: {}]   ;;  %s384_s2 = inlined_call_operand.vmem [shape: f32[1,128], index: 2, kind: input, shape index: {}]   ;;  %s385_s3 = inlined_call_operand.hbm [shape: f32[8,128], index: 3, kind: output, shape index: {}]  }
   0x1   :  { %9 = vsyncpa [#allocation7], 0 }
   0x2   :  { %10 = vsyncpa [#allocation5], 0  ;;  %s309_s12 = smov [#allocation3]   ;;  %s310_s14 = smov [#allocation6]  }
   0x3   :  { %s17_s13 = sshll.u32 %s309_s12, 4  ;;  %s26_s15 = sshll.u32 %s310_s14, 4  ;;  %s18_s13 = int_to_ptr.vmem [resolvable:$true] %s17_s13  ;;  %s336_s15 = int_to_ptr.vmem [resolvable:$true] %s26_s15 }
   0x4   :  { %s237_s18 = scalar_lea.hbm %s382_s0, 128 }
   0x5   :  { %p238_p0 = scmp.ne.s32.totalorder %s382_s0, %s237_s18  ;;  %p241_p1 = scmp.lt.u32.totalorder %s237_s18, %s382_s0 }
   0x7   :  { %p243_p2 = pnand %p241_p1, %p238_p0 }
   0x9   :  { %246 = shalt.err (!%p243_p2)
}
   0xa   :  { %s247_s23 = scalar_lea.vmem %s18_s13, 128  ;;  %p252_p4 = scmp.lt.s32.totalorder %s18_s13, %s18_s13 }
   0xb   :  { %p248_p3 = scmp.ne.s32.totalorder %s18_s13, %s247_s23  ;;  %p253_p5 = scmp.lt.s32.totalorder %s247_s23, %s247_s23 }
   0xd   :  { %p254_p6 = por %p253_p5, %p252_p4 }
   0xf   :  { %p255_p7 = pnand %p254_p6, %p248_p3 }
  0x11   :  { %258 = shalt.err (!%p255_p7)
}
  0x12   :  { %20 = dma.hbm_to_vmem [thread:$0]  %s382_s0, 128, %s18_s13, [#allocation4]  }
  0x13   :  { %s259_s28 = scalar_lea.hbm %s383_s1, 1024 }
  0x14   :  { %p260_p8 = scmp.ne.s32.totalorder %s383_s1, %s259_s28  ;;  %p263_p9 = scmp.lt.u32.totalorder %s259_s28, %s383_s1 }
  0x16   :  { %p265_p10 = pnand %p263_p9, %p260_p8 }
  0x18   :  { %268 = shalt.err (!%p265_p10)
}
  0x19   :  { %s269_s6 = scalar_lea.vmem %s336_s15, 1024  ;;  %p274_p12 = scmp.lt.s32.totalorder %s336_s15, %s336_s15 }
  0x1a   :  { %p270_p11 = scmp.ne.s32.totalorder %s336_s15, %s269_s6  ;;  %p275_p13 = scmp.lt.s32.totalorder %s269_s6, %s269_s6 }
  0x1c   :  { %p276_p0 = por %p275_p13, %p274_p12 }
  0x1e   :  { %p277_p1 = pnand %p276_p0, %p270_p11 }
  0x20   :  { %280 = shalt.err (!%p277_p1)
}
  0x21   :  { %s311_s0 = smov 64   ;;  %s312_s7 = smov 4  }
  0x22   :  { %32 = dma.hbm_to_vmem [thread:$0]  %s383_s1, 1024, %s336_s15, [#allocation7], %s311_s0, %s311_s0, %s312_s7  }
  0x23   :  { %303 = dma.done.wait [#allocation4], 128  }
  0x24   :  { %304 = vsyncadd [#allocation4], 4294967168 }
  0x25   :  { %305 = dma.done.wait [#allocation7], 1024  }
  0x26   :  { %306 = vsyncadd [#allocation7], 4294966272  ;;  %v313_v0 = vmov 0.0   ;;  %vm314_vm0 = vmmov 0   ;;  %v229_v1 = vld [vmem:[#allocation6] sm:$0xff]   ;;  %v230_v2 = vld [vmem:[#allocation6 + $0x8] sm:$0xff]  }
  0x27   :  { %202 = vmatprep.subr.bf16.mxu0 %v313_v0  ;;  %218 = vmatprep.mubr.msk.bf16.mxu0 %vm314_vm0, %v313_v0  ;;  %v231_v3 = vld [vmem:[#allocation6 + $0x10] sm:$0xff]   ;;  %v232_v4 = vld [vmem:[#allocation6 + $0x18] sm:$0xff]   ;;  %v233_v5 = vld [vmem:[#allocation6 + $0x20] sm:$0xff]   ;;  %s315_s11 = smov [#allocation8]  }
  0x28   :  { %203 = vmatpush3.bf16.msra.mxu0 %v229_v1  ;;  %v234_v6 = vld [vmem:[#allocation6 + $0x28] sm:$0xff]   ;;  %v235_v7 = vld [vmem:[#allocation6 + $0x30] sm:$0xff]   ;;  %v236_v8 = vld [vmem:[#allocation6 + $0x38] sm:$0xff]   ;;  %s174_s12 = sshll.u32 %s315_s11, 4  ;;  %s175_s12 = int_to_ptr.vmem [resolvable:$true] %s174_s12 }
  0x29   :  { %204 = vmatprep.subr.bf16.mxu0 %v313_v0  ;;  %v55_v9 = vld [vmem:[#allocation3] sm:$0xff]  ;;  %s281_s13 = scalar_lea.vmem %s175_s12, 128  ;;  %p286_p3 = scmp.lt.s32.totalorder %s175_s12, %s175_s12 }
  0x2a   :  { %v56_v10 = vpack.c.bf16 %v55_v9, %v55_v9  ;;  %v184_v11 = vld [vmem:[%s384_s2] ss:$0 sm:$0xff]  ;;  %p282_p2 = scmp.ne.s32.totalorder %s175_s12, %s281_s13  ;;  %p287_p4 = scmp.lt.s32.totalorder %s281_s13, %s281_s13 }
  0x2c   :  { %205 = vmatpush3.bf16.msra.mxu0 %v230_v2  ;;  %p288_p5 = por %p287_p4, %p286_p3 }
  0x2d   :  { %206 = vmatprep.subr.bf16.mxu0 %v313_v0 }
  0x2e   :  { %p289_p6 = pnand %p288_p5, %p282_p2 }
  0x30   :  { %207 = vmatpush3.bf16.msra.mxu0 %v231_v3 }
  0x31   :  { %208 = vmatprep.subr.bf16.mxu0 %v313_v0 }
  0x34   :  { %209 = vmatpush3.bf16.msra.mxu0 %v232_v4 }
  0x35   :  { %210 = vmatprep.subr.bf16.mxu0 %v313_v0 }
  0x38   :  { %211 = vmatpush3.bf16.msra.mxu0 %v233_v5 }
  0x39   :  { %212 = vmatprep.subr.bf16.mxu0 %v313_v0 }
  0x3c   :  { %213 = vmatpush3.bf16.msra.mxu0 %v234_v6 }
  0x3d   :  { %214 = vmatprep.subr.bf16.mxu0 %v313_v0 }
  0x40   :  { %215 = vmatpush3.bf16.msra.mxu0 %v235_v7 }
  0x41   :  { %216 = vmatprep.subr.bf16.mxu0 %v313_v0 }
  0x44   :  { %217 = vmatpush3.bf16.msra.mxu0 %v236_v8 }
  0x47   :  { %219 = vmatmul.mubr.bf16.vlgmr.msra.gmra.mrb[0].mxu0 %v56_v10 }
 0x11a   :  { %v155_v12 = vpop.f32.mrb[0].mxu0 }
 0x11b   :  { %v161_v13 = vadd.f32 %v184_v11, %v155_v12  ;;  %v220_v14 = vpop.f32.mrb[1].mxu0 }
 0x11c   :  { %v158_v15 = vpop.f32.mrb[2].mxu0 }
 0x11d   :  { %167 = vst [vmem:[#allocation8] sm:$0xff] %v161_v13  ;;  %v221_v16 = vpop.f32.mrb[3].mxu0 }
 0x11e   :  { %292 = shalt.err (!%p289_p6)
}
 0x11f   :  { %s293_s2 = scalar_lea.hbm %s385_s3, 128 }
 0x120   :  { %p294_p7 = scmp.ne.s32.totalorder %s385_s3, %s293_s2  ;;  %p297_p8 = scmp.lt.u32.totalorder %s293_s2, %s385_s3 }
 0x122   :  { %p299_p9 = pnand %p297_p8, %p294_p7 }
 0x124   :  { %302 = shalt.err (!%p299_p9)
}
 0x125   :  { %177 = dma.vmem_to_hbm [thread:$0]  %s175_s12, 128, %s385_s3, [#allocation5]  }
 0x126   :  { %307 = dma.done.wait [#allocation5], 128  }
 0x127   :  { %308 = vsyncadd [#allocation5], 4294967168 }
 0x128   :  { %181 = vsyncpa [#allocation4], 1 }
 0x129   :  { %182 = vsyncpa [#allocation7], 1 }
 0x12a   :  { %183 = vsyncpa [#allocation5], 1 }

</bundles_post_ra>
